<compile_context>
chip_gen: v7x
topology: tpu7x:2x2x1
jax: 0.10.0
libtpu: 0.0.40
codegen_flags: <defaults>
</compile_context>

<pallas_src>
import functools

import jax
import jax.numpy as jnp
from jax.experimental import pallas as pl
from jax.experimental.pallas import tpu as pltpu  # noqa: F401  (TPU backend)
from jax.scipy.special import digamma, gammaln

# ----------------------------------------------------------------------------
# problem sizes (small, consistent with the module)
# ----------------------------------------------------------------------------
V = 2        # num_views
B = 8        # batch
DIN = 16     # raw per-view input dim
D = 32       # comm_feature_dim
C = 4        # num_classes
LAMBDA_EPOCHS = 10.0
ARGS = dict(delta=1.0, eta=0.1, gamma=1.0)

assert C >= 3, "scalar losses are packed into the first 3 lanes of one C-wide row"

# ----------------------------------------------------------------------------
# packed parameter-slab layout (rows are 8-aligned regions, lanes start at 0)
# ----------------------------------------------------------------------------
def _align8(n):
    return (n + 7) // 8 * 8


_VB_W = V * 2 * D            # 128 : block-diagonal view-block output width
_EVQK_W = C + 2 * D          # 68  : fused [evidence | q | k] output width
assert _VB_W <= 128 and _EVQK_W <= 128 and (V + C) <= 128 and D <= 128

R_VB = 0                               # (V*DIN, V*2D) block-diag view blocks
R_CE = _align8(V * DIN)                # (D, D)   fc_comm_extract
R_DP = R_CE + _align8(D)               # (D, V+C) discriminator || predictor
R_EVQK = R_DP + _align8(D)             # V regions of (D, C+2D)
R_BIAS = R_EVQK + V * _align8(D)       # 5 bias rows
P_ROWS = _align8(R_BIAS + 5)           # total slab rows (=168 for this config)

_OUT_BLOCKS = 2 * V + 2                # [attn_v | evid_v | evid_a | scalars]


# ----------------------------------------------------------------------------
# fused Pallas kernel (whole forward up to the Dirichlet losses)
# ----------------------------------------------------------------------------
def _gtmc_fused_kernel(data_ref, p_ref, out_ref):
    f32 = jnp.float32
    x = data_ref[:, 0:V * DIN]                                    # (B, V*DIN)
    y = data_ref[:, V * DIN:V * DIN + C]                          # (B, C)

    # ---- view blocks: ONE block-diagonal matmul (B,V*DIN)@(V*DIN,V*2D) -----
    # TODO(synk): real view_block definition not provided; Linear pair used.
    h = (jnp.dot(x, p_ref[R_VB:R_VB + V * DIN, 0:_VB_W],
                 preferred_element_type=f32)
         + p_ref[R_BIAS:R_BIAS + 1, 0:_VB_W])                     # (B, V*2D)
    fs = [h[:, v * 2 * D:v * 2 * D + D] for v in range(V)]        # view-specific
    fc = [h[:, v * 2 * D + D:(v + 1) * 2 * D] for v in range(V)]  # shareable

    # ---- common-feature path: views folded into rows ------------------------
    fc_all = jnp.concatenate(fc, axis=0)                          # (V*B, D)
    vc_all = (jnp.dot(fc_all, p_ref[R_CE:R_CE + D, 0:D],
                      preferred_element_type=f32)
              + p_ref[R_BIAS + 1:R_BIAS + 2, 0:D])                # (V*B, D)
    dp_all = (jnp.dot(vc_all, p_ref[R_DP:R_DP + D, 0:V + C],
                      preferred_element_type=f32)
              + p_ref[R_BIAS + 2:R_BIAS + 3, 0:V + C])            # (V*B, V+C)
    disc = dp_all[:, 0:V]
    pred = dp_all[:, V:V + C]

    comm = vc_all[0:B]
    for v in range(1, V):
        comm = comm + vc_all[v * B:(v + 1) * B]
    comm = comm * f32(1.0 / V)                                    # (B, D)

    # GAN CE term (exp(-.) applied in host glue)
    # TODO(synk): KL_loss implementation not provided; CE to one-hot used.
    logp = jax.nn.log_softmax(disc, axis=-1)                      # (V*B, V)
    gan_2d = jnp.zeros((1, 1), f32)
    for v in range(V):
        gan_2d = gan_2d + jnp.sum(-logp[v * B:(v + 1) * B, v:v + 1],
                                  axis=0, keepdims=True)
    gan_2d = gan_2d * f32(1.0 / (B * V))

    # comm ML loss
    # TODO(synk): logit_ML_loss not provided; multi-label BCE-with-logits used.
    y_all = jnp.concatenate([y] * V, axis=0)                      # (V*B, C)
    t = jax.nn.softplus(pred) - pred * y_all
    comm_2d = jnp.sum(jnp.sum(t, axis=1, keepdims=True), axis=0, keepdims=True)
    comm_2d = comm_2d * f32(1.0 / (V * B * C))

    # ---- per-view fused [evidence | q | k] matmul ---------------------------
    # TODO(synk): exact RCML_View / Attention projections not provided;
    # Linear+softplus evidences and scaled dot-product attention used.
    ev, q, k = [], [], []
    for v in range(V):
        z = fs[v] + comm                                          # (B, D)
        r0 = R_EVQK + v * _align8(D)
        o = (jnp.dot(z, p_ref[r0:r0 + D, 0:_EVQK_W],
                     preferred_element_type=f32)
             + p_ref[R_BIAS + 3 + v:R_BIAS + 4 + v, 0:_EVQK_W])   # (B, C+2D)
        ev.append(jax.nn.softplus(o[:, 0:C]))                     # (B, C)
        q.append(o[:, C:C + D])                                   # (B, D)
        k.append(o[:, C + D:C + 2 * D])                           # (B, D)

    # ---- attention over views (exact softmax normalization) ----------------
    attn_out = []
    for i in range(V):
        s_ij = [jnp.sum(q[i] * k[j], axis=-1, keepdims=True) for j in range(V)]
        m = s_ij[0]
        for j in range(1, V):
            m = jnp.maximum(m, s_ij[j])
        e_ij = [jnp.exp(s - m) for s in s_ij]
        den = e_ij[0]
        for j in range(1, V):
            den = den + e_ij[j]
        acc = (e_ij[0] / den) * ev[0]
        for j in range(1, V):
            acc = acc + (e_ij[j] / den) * ev[j]
        attn_out.append(acc)                                      # (B, C)

    evid_a = attn_out[0]
    for v in range(1, V):
        evid_a = evid_a + attn_out[v]
    evid_a = evid_a * f32(1.0 / V)                                # (B, C)

    # ---- orthogonality: single stacked matmul, one relayout of comm --------
    fs_all = jnp.concatenate(fs, axis=0)                          # (V*B, D)
    g = jax.lax.dot_general(fs_all, comm, (((1,), (1,)), ((), ())),
                            preferred_element_type=f32)           # (V*B, B)
    orth_2d = jnp.sum(jnp.sum(g * g, axis=1, keepdims=True),
                      axis=0, keepdims=True)

    # ---- packed output slab: every block write starts at sublane/lane 0 ----
    for i in range(V):
        out_ref[i] = attn_out[i]                                  # attention evid
        out_ref[V + i] = ev[i]                                    # per-view evid
    out_ref[2 * V] = evid_a
    pads = [gan_2d, comm_2d, orth_2d]
    if C > 3:
        pads.append(jnp.zeros((1, C - 3), f32))
    srow = jnp.concatenate(pads, axis=1)                          # (1, C)
    out_ref[2 * V + 1] = jnp.broadcast_to(srow, (B, C))           # scalars row


def run_gtmc_fused(data_slab, params_slab):
    # Whole-array VMEM blocks, single gridless invocation:
    #   2 input DMAs (data slab + packed weight slab), 1 output DMA.
    return pl.pallas_call(
        _gtmc_fused_kernel,
        out_shape=jax.ShapeDtypeStruct((_OUT_BLOCKS, B, C), jnp.float32),
    )(data_slab, params_slab)


# ----------------------------------------------------------------------------
# Dirichlet (EDL) losses: digamma/gammaln not lowerable in Mosaic -> host JAX,
# vectorized over (B, V) with a single mean (no per-view python loops).
# ----------------------------------------------------------------------------
def _kl_dirichlet_to_uniform(alpha, num_classes):
    s = jnp.sum(alpha, axis=-1, keepdims=True)
    term1 = (gammaln(s[..., 0]) - jnp.sum(gammaln(alpha), axis=-1)
             - gammaln(jnp.float32(num_classes)))
    term2 = jnp.sum((alpha - 1.0) * (digamma(alpha) - digamma(s)), axis=-1)
    return term1 + term2


def edl_ce_loss(evidence, y_onehot, epoch, lambda_epochs, num_classes):
    # TODO(synk): exact RCML loss (incl. conflictive-degree / gamma term) not
    # provided; standard EDL cross-entropy with annealed KL regularizer used.
    alpha = evidence + 1.0
    s = jnp.sum(alpha, axis=-1, keepdims=True)
    a_term = jnp.sum(y_onehot * (digamma(s) - digamma(alpha)), axis=-1)
    annealing = jnp.minimum(1.0, epoch / lambda_epochs)
    kl_alpha = y_onehot + (1.0 - y_onehot) * alpha
    kl = _kl_dirichlet_to_uniform(kl_alpha, num_classes)
    return jnp.mean(a_term + annealing * kl)


# ----------------------------------------------------------------------------
# full forward
# ----------------------------------------------------------------------------
def gtmc_hoa_forward(params_slab, x_list, labels, epoch):
    y_onehot = jax.nn.one_hot(labels, C, dtype=jnp.float32)
    data_slab = jnp.concatenate(list(x_list) + [y_onehot], axis=1)  # (B, V*DIN+C)

    out = run_gtmc_fused(data_slab, params_slab)                    # (2V+2, B, C)

    evidences_attention = jnp.transpose(out[0:V], (1, 0, 2))        # (B, V, C)
    evidences_views = jnp.transpose(out[V:2 * V], (1, 0, 2))        # (B, V, C)
    evidence_a = out[2 * V]                                         # (B, C)
    gan_ce = out[2 * V + 1, 0, 0]
    comm_ml_loss = out[2 * V + 1, 0, 1]
    orth_raw = out[2 * V + 1, 0, 2]

    gan_loss = jnp.exp(-gan_ce)
    orth = orth_raw / jnp.float32(B * B) / jnp.float32(V)

    y_bvc = y_onehot[:, None, :]
    rcml_views_loss = edl_ce_loss(evidences_views, y_bvc, epoch, LAMBDA_EPOCHS, C)
    rcml_loss = (edl_ce_loss(evidence_a, y_onehot, epoch, LAMBDA_EPOCHS, C)
                 + edl_ce_loss(evidences_attention, y_bvc, epoch, LAMBDA_EPOCHS, C))

    loss = (gan_loss + comm_ml_loss) * ARGS["delta"]
    loss = loss + orth * ARGS["eta"]
    loss = loss + rcml_views_loss
    loss = loss + rcml_loss
    return evidences_attention, evidence_a, loss


# ----------------------------------------------------------------------------
# deterministic parameter construction -> ONE packed (P_ROWS, 128) slab
# ----------------------------------------------------------------------------
def make_params(key):
    ks = jax.random.split(key, 8)

    def w(k, shape, fan_in):
        return jax.random.normal(k, shape, jnp.float32) / jnp.sqrt(jnp.float32(fan_in))

    w_spec = w(ks[0], (V, DIN, D), DIN)
    w_comm = w(ks[1], (V, DIN, D), DIN)
    w_vb = jnp.concatenate([w_spec, w_comm], axis=-1)              # (V, DIN, 2D)
    b_vb = jnp.zeros((V, 2 * D), jnp.float32)

    w_ce = w(ks[2], (D, D), D)
    b_ce = jnp.zeros((D,), jnp.float32)
    w_disc = w(ks[3], (D, V), D)
    w_pred = w(ks[4], (D, C), D)
    w_dp = jnp.concatenate([w_disc, w_pred], axis=-1)              # (D, V+C)
    b_dp = jnp.zeros((V + C,), jnp.float32)

    w_ev = w(ks[5], (V, D, C), D)
    b_ev = jnp.zeros((V, C), jnp.float32)
    w_q = w(ks[6], (D, D), D) / jnp.sqrt(jnp.float32(D))           # scale folded in
    w_k = w(ks[7], (D, D), D)

    P = jnp.zeros((P_ROWS, 128), jnp.float32)

    # block-diagonal view-block weight: view v occupies rows v*DIN..(v+1)*DIN,
    # lanes v*2D..(v+1)*2D, so one (B,V*DIN)@(V*DIN,V*2D) matmul does all views.
    b_vbd = jnp.zeros((_VB_W,), jnp.float32)
    for v in range(V):
        P = P.at[R_VB + v * DIN:R_VB + (v + 1) * DIN,
                 v * 2 * D:(v + 1) * 2 * D].set(w_vb[v])
        b_vbd = b_vbd.at[v * 2 * D:(v + 1) * 2 * D].set(b_vb[v])

    P = P.at[R_CE:R_CE + D, 0:D].set(w_ce)
    P = P.at[R_DP:R_DP + D, 0:V + C].set(w_dp)

    for v in range(V):
        w_evqk = jnp.concatenate([w_ev[v], w_q, w_k], axis=1)      # (D, C+2D)
        b_evqk = jnp.concatenate([b_ev[v], jnp.zeros((2 * D,), jnp.float32)])
        r0 = R_EVQK + v * _align8(D)
        P = P.at[r0:r0 + D, 0:_EVQK_W].set(w_evqk)
        P = P.at[R_BIAS + 3 + v, 0:_EVQK_W].set(b_evqk)

    P = P.at[R_BIAS, 0:_VB_W].set(b_vbd)
    P = P.at[R_BIAS + 1, 0:D].set(b_ce)
    P = P.at[R_BIAS + 2, 0:V + C].set(b_dp)
    return P


if __name__ == "__main__":
    key = jax.random.PRNGKey(0)
    kp, kx0, kx1, kl = jax.random.split(key, 4)
    params_slab = make_params(kp)
    x_list = [
        jax.random.normal(kx0, (B, DIN), jnp.float32),
        jax.random.normal(kx1, (B, DIN), jnp.float32),
    ]
    labels = jax.random.randint(kl, (B,), 0, C)
    epoch = jnp.float32(1.0)

    fwd = jax.jit(functools.partial(gtmc_hoa_forward, params_slab))
    evidences, evidence_a, loss = fwd(x_list, labels, epoch)
    jax.block_until_ready((evidences, evidence_a, loss))
    assert evidences.shape == (B, V, C)
    assert evidence_a.shape == (B, C)
    assert bool(jnp.isfinite(loss))
    print("KERNEL_OK")
</pallas_src>

<mosaic_0001>
module attributes {stable_mosaic.version = 11 : i64} {
  func.func @_gtmc_fused_kernel(%arg0: memref<8x36xf32, #tpu.memory_space<vmem>>, %arg1: memref<168x128xf32, #tpu.memory_space<vmem>>, %arg2: memref<6x8x4xf32, #tpu.memory_space<vmem>>) attributes {dimension_semantics = [], scalar_prefetch = 0 : i64, scratch_operands = 0 : i64, tpu.core_type = #tpu.core_type<tc>} {
    %c0 = arith.constant 0 : index
    %c0_0 = arith.constant 0 : index
    %0 = vector.load %arg0[%c0, %c0_0] : memref<8x36xf32, #tpu.memory_space<vmem>>, vector<8x32xf32>
    %c0_1 = arith.constant 0 : index
    %c32 = arith.constant 32 : index
    %1 = vector.load %arg0[%c0_1, %c32] : memref<8x36xf32, #tpu.memory_space<vmem>>, vector<8x4xf32>
    %c0_2 = arith.constant 0 : index
    %c0_3 = arith.constant 0 : index
    %2 = vector.load %arg1[%c0_2, %c0_3] : memref<168x128xf32, #tpu.memory_space<vmem>>, vector<32x128xf32>
    %cst = arith.constant dense<0.000000e+00> : vector<8x128xf32>
    %3 = tpu.matmul %0, %2, %cst {dimension_numbers = #tpu.dot_dimension_numbers<[1], [0], [0], [1], [0, 0, 1, 1], [], []>} : vector<8x32xf32>, vector<32x128xf32>, vector<8x128xf32> -> vector<8x128xf32>
    %c160 = arith.constant 160 : index
    %c0_4 = arith.constant 0 : index
    %4 = vector.load %arg1[%c160, %c0_4] : memref<168x128xf32, #tpu.memory_space<vmem>>, vector<1x128xf32>
    %5 = vector.broadcast %4 : vector<1x128xf32> to vector<8x128xf32>
    %6 = arith.addf %3, %5 : vector<8x128xf32>
    %7 = vector.extract_strided_slice %6 {offsets = [0, 0], sizes = [8, 32], strides = [1, 1]} : vector<8x128xf32> to vector<8x32xf32>
    %8 = vector.extract_strided_slice %6 {offsets = [0, 64], sizes = [8, 32], strides = [1, 1]} : vector<8x128xf32> to vector<8x32xf32>
    %9 = vector.extract_strided_slice %6 {offsets = [0, 32], sizes = [8, 32], strides = [1, 1]} : vector<8x128xf32> to vector<8x32xf32>
    %10 = vector.extract_strided_slice %6 {offsets = [0, 96], sizes = [8, 32], strides = [1, 1]} : vector<8x128xf32> to vector<8x32xf32>
    %11 = tpu.concatenate %9, %10 in 0 : vector<8x32xf32>, vector<8x32xf32> -> vector<16x32xf32>
    %c32_5 = arith.constant 32 : index
    %c0_6 = arith.constant 0 : index
    %12 = vector.load %arg1[%c32_5, %c0_6] : memref<168x128xf32, #tpu.memory_space<vmem>>, vector<32x32xf32>
    %cst_7 = arith.constant dense<0.000000e+00> : vector<16x32xf32>
    %13 = tpu.matmul %11, %12, %cst_7 {dimension_numbers = #tpu.dot_dimension_numbers<[1], [0], [0], [1], [0, 0, 1, 1], [], []>} : vector<16x32xf32>, vector<32x32xf32>, vector<16x32xf32> -> vector<16x32xf32>
    %c161 = arith.constant 161 : index
    %c0_8 = arith.constant 0 : index
    %14 = vector.load %arg1[%c161, %c0_8] : memref<168x128xf32, #tpu.memory_space<vmem>>, vector<1x32xf32>
    %15 = vector.broadcast %14 : vector<1x32xf32> to vector<16x32xf32>
    %16 = arith.addf %13, %15 : vector<16x32xf32>
    %c64 = arith.constant 64 : index
    %c0_9 = arith.constant 0 : index
    %17 = vector.load %arg1[%c64, %c0_9] : memref<168x128xf32, #tpu.memory_space<vmem>>, vector<32x6xf32>
    %cst_10 = arith.constant dense<0.000000e+00> : vector<16x6xf32>
    %18 = tpu.matmul %16, %17, %cst_10 {dimension_numbers = #tpu.dot_dimension_numbers<[1], [0], [0], [1], [0, 0, 1, 1], [], []>} : vector<16x32xf32>, vector<32x6xf32>, vector<16x6xf32> -> vector<16x6xf32>
    %c162 = arith.constant 162 : index
    %c0_11 = arith.constant 0 : index
    %19 = vector.load %arg1[%c162, %c0_11] : memref<168x128xf32, #tpu.memory_space<vmem>>, vector<1x6xf32>
    %20 = vector.broadcast %19 : vector<1x6xf32> to vector<16x6xf32>
    %21 = arith.addf %18, %20 : vector<16x6xf32>
    %22 = vector.extract_strided_slice %21 {offsets = [0, 0], sizes = [16, 2], strides = [1, 1]} : vector<16x6xf32> to vector<16x2xf32>
    %23 = vector.extract_strided_slice %21 {offsets = [0, 2], sizes = [16, 4], strides = [1, 1]} : vector<16x6xf32> to vector<16x4xf32>
    %24 = vector.extract_strided_slice %16 {offsets = [0, 0], sizes = [8, 32], strides = [1, 1]} : vector<16x32xf32> to vector<8x32xf32>
    %25 = vector.extract_strided_slice %16 {offsets = [8, 0], sizes = [8, 32], strides = [1, 1]} : vector<16x32xf32> to vector<8x32xf32>
    %26 = arith.addf %24, %25 : vector<8x32xf32>
    %cst_12 = arith.constant 5.000000e-01 : f32
    %27 = vector.broadcast %cst_12 : f32 to vector<8x32xf32>
    %28 = arith.mulf %26, %27 : vector<8x32xf32>
    %cst_13 = arith.constant dense<0xFF800000> : vector<16xf32>
    %29 = vector.multi_reduction <maximumf>, %22, %cst_13 [1] : vector<16x2xf32> to vector<16xf32>
    %cst_14 = arith.constant 0xFF800000 : f32
    %30 = vector.broadcast %cst_14 : f32 to vector<16xf32>
    %31 = arith.maximumf %30, %29 : vector<16xf32>
    %32 = vector.shape_cast %31 : vector<16xf32> to vector<16x1xf32>
    %33 = vector.broadcast %32 : vector<16x1xf32> to vector<16x2xf32>
    %34 = arith.subf %22, %33 : vector<16x2xf32>
    %35 = math.exp %34 : vector<16x2xf32>
    %cst_15 = arith.constant dense<0.000000e+00> : vector<16xf32>
    %36 = vector.multi_reduction <add>, %35, %cst_15 [1] : vector<16x2xf32> to vector<16xf32>
    %37 = vector.shape_cast %36 : vector<16xf32> to vector<16x1xf32>
    %38 = math.log %37 : vector<16x1xf32>
    %39 = vector.broadcast %38 : vector<16x1xf32> to vector<16x2xf32>
    %40 = arith.subf %34, %39 : vector<16x2xf32>
    %cst_16 = arith.constant 0.000000e+00 : f32
    %41 = vector.broadcast %cst_16 : f32 to vector<1x1xf32>
    %42 = vector.extract_strided_slice %40 {offsets = [0, 0], sizes = [8, 1], strides = [1, 1]} : vector<16x2xf32> to vector<8x1xf32>
    %cst_17 = arith.constant 0.000000e+00 : f32
    %43 = vector.broadcast %cst_17 : f32 to vector<8x1xf32>
    %44 = arith.subf %43, %42 : vector<8x1xf32>
    %cst_18 = arith.constant dense<0.000000e+00> : vector<1xf32>
    %45 = vector.multi_reduction <add>, %44, %cst_18 [0] : vector<8x1xf32> to vector<1xf32>
    %46 = vector.shape_cast %45 : vector<1xf32> to vector<1x1xf32>
    %47 = arith.addf %41, %46 : vector<1x1xf32>
    %48 = vector.extract_strided_slice %40 {offsets = [8, 1], sizes = [8, 1], strides = [1, 1]} : vector<16x2xf32> to vector<8x1xf32>
    %cst_19 = arith.constant 0.000000e+00 : f32
    %49 = vector.broadcast %cst_19 : f32 to vector<8x1xf32>
    %50 = arith.subf %49, %48 : vector<8x1xf32>
    %cst_20 = arith.constant dense<0.000000e+00> : vector<1xf32>
    %51 = vector.multi_reduction <add>, %50, %cst_20 [0] : vector<8x1xf32> to vector<1xf32>
    %52 = vector.shape_cast %51 : vector<1xf32> to vector<1x1xf32>
    %53 = arith.addf %47, %52 : vector<1x1xf32>
    %cst_21 = arith.constant 6.250000e-02 : f32
    %54 = vector.broadcast %cst_21 : f32 to vector<1x1xf32>
    %55 = arith.mulf %53, %54 : vector<1x1xf32>
    %56 = tpu.concatenate %1, %1 in 0 : vector<8x4xf32>, vector<8x4xf32> -> vector<16x4xf32>
    %cst_22 = arith.constant 0.000000e+00 : f32
    %57 = vector.broadcast %cst_22 : f32 to vector<16x4xf32>
    %58 = arith.maximumf %23, %57 : vector<16x4xf32>
    %59 = vector.broadcast %cst_22 : f32 to vector<16x4xf32>
    %60 = arith.subf %23, %59 : vector<16x4xf32>
    %61 = arith.cmpf one, %60, %60 : vector<16x4xf32>
    %62 = vector.broadcast %cst_22 : f32 to vector<16x4xf32>
    %63 = arith.addf %23, %62 : vector<16x4xf32>
    %64 = math.absf %60 : vector<16x4xf32>
    %cst_23 = arith.constant 0.000000e+00 : f32
    %65 = vector.broadcast %cst_23 : f32 to vector<16x4xf32>
    %66 = arith.subf %65, %64 : vector<16x4xf32>
    %67 = math.exp %66 : vector<16x4xf32>
    %68 = math.log1p %67 : vector<16x4xf32>
    %69 = arith.addf %58, %68 : vector<16x4xf32>
    %70 = arith.select %61, %63, %69 : vector<16x4xi1>, vector<16x4xf32>
    %71 = arith.mulf %23, %56 : vector<16x4xf32>
    %72 = arith.subf %70, %71 : vector<16x4xf32>
    %cst_24 = arith.constant dense<0.000000e+00> : vector<16xf32>
    %73 = vector.multi_reduction <add>, %72, %cst_24 [1] : vector<16x4xf32> to vector<16xf32>
    %74 = vector.shape_cast %73 : vector<16xf32> to vector<16x1xf32>
    %cst_25 = arith.constant dense<0.000000e+00> : vector<1xf32>
    %75 = vector.multi_reduction <add>, %74, %cst_25 [0] : vector<16x1xf32> to vector<1xf32>
    %76 = vector.shape_cast %75 : vector<1xf32> to vector<1x1xf32>
    %cst_26 = arith.constant 1.562500e-02 : f32
    %77 = vector.broadcast %cst_26 : f32 to vector<1x1xf32>
    %78 = arith.mulf %76, %77 : vector<1x1xf32>
    %79 = arith.addf %7, %28 : vector<8x32xf32>
    %c96 = arith.constant 96 : index
    %c0_27 = arith.constant 0 : index
    %80 = vector.load %arg1[%c96, %c0_27] : memref<168x128xf32, #tpu.memory_space<vmem>>, vector<32x68xf32>
    %cst_28 = arith.constant dense<0.000000e+00> : vector<8x68xf32>
    %81 = tpu.matmul %79, %80, %cst_28 {dimension_numbers = #tpu.dot_dimension_numbers<[1], [0], [0], [1], [0, 0, 1, 1], [], []>} : vector<8x32xf32>, vector<32x68xf32>, vector<8x68xf32> -> vector<8x68xf32>
    %c163 = arith.constant 163 : index
    %c0_29 = arith.constant 0 : index
    %82 = vector.load %arg1[%c163, %c0_29] : memref<168x128xf32, #tpu.memory_space<vmem>>, vector<1x68xf32>
    %83 = vector.broadcast %82 : vector<1x68xf32> to vector<8x68xf32>
    %84 = arith.addf %81, %83 : vector<8x68xf32>
    %85 = vector.extract_strided_slice %84 {offsets = [0, 0], sizes = [8, 4], strides = [1, 1]} : vector<8x68xf32> to vector<8x4xf32>
    %cst_30 = arith.constant 0.000000e+00 : f32
    %86 = vector.broadcast %cst_30 : f32 to vector<8x4xf32>
    %87 = arith.maximumf %85, %86 : vector<8x4xf32>
    %88 = vector.broadcast %cst_30 : f32 to vector<8x4xf32>
    %89 = arith.subf %85, %88 : vector<8x4xf32>
    %90 = arith.cmpf one, %89, %89 : vector<8x4xf32>
    %91 = vector.broadcast %cst_30 : f32 to vector<8x4xf32>
    %92 = arith.addf %85, %91 : vector<8x4xf32>
    %93 = math.absf %89 : vector<8x4xf32>
    %cst_31 = arith.constant 0.000000e+00 : f32
    %94 = vector.broadcast %cst_31 : f32 to vector<8x4xf32>
    %95 = arith.subf %94, %93 : vector<8x4xf32>
    %96 = math.exp %95 : vector<8x4xf32>
    %97 = math.log1p %96 : vector<8x4xf32>
    %98 = arith.addf %87, %97 : vector<8x4xf32>
    %99 = arith.select %90, %92, %98 : vector<8x4xi1>, vector<8x4xf32>
    %100 = vector.extract_strided_slice %84 {offsets = [0, 4], sizes = [8, 32], strides = [1, 1]} : vector<8x68xf32> to vector<8x32xf32>
    %101 = vector.extract_strided_slice %84 {offsets = [0, 36], sizes = [8, 32], strides = [1, 1]} : vector<8x68xf32> to vector<8x32xf32>
    %102 = arith.addf %8, %28 : vector<8x32xf32>
    %c128 = arith.constant 128 : index
    %c0_32 = arith.constant 0 : index
    %103 = vector.load %arg1[%c128, %c0_32] : memref<168x128xf32, #tpu.memory_space<vmem>>, vector<32x68xf32>
    %cst_33 = arith.constant dense<0.000000e+00> : vector<8x68xf32>
    %104 = tpu.matmul %102, %103, %cst_33 {dimension_numbers = #tpu.dot_dimension_numbers<[1], [0], [0], [1], [0, 0, 1, 1], [], []>} : vector<8x32xf32>, vector<32x68xf32>, vector<8x68xf32> -> vector<8x68xf32>
    %c164 = arith.constant 164 : index
    %c0_34 = arith.constant 0 : index
    %105 = vector.load %arg1[%c164, %c0_34] : memref<168x128xf32, #tpu.memory_space<vmem>>, vector<1x68xf32>
    %106 = vector.broadcast %105 : vector<1x68xf32> to vector<8x68xf32>
    %107 = arith.addf %104, %106 : vector<8x68xf32>
    %108 = vector.extract_strided_slice %107 {offsets = [0, 0], sizes = [8, 4], strides = [1, 1]} : vector<8x68xf32> to vector<8x4xf32>
    %cst_35 = arith.constant 0.000000e+00 : f32
    %109 = vector.broadcast %cst_35 : f32 to vector<8x4xf32>
    %110 = arith.maximumf %108, %109 : vector<8x4xf32>
    %111 = vector.broadcast %cst_35 : f32 to vector<8x4xf32>
    %112 = arith.subf %108, %111 : vector<8x4xf32>
    %113 = arith.cmpf one, %112, %112 : vector<8x4xf32>
    %114 = vector.broadcast %cst_35 : f32 to vector<8x4xf32>
    %115 = arith.addf %108, %114 : vector<8x4xf32>
    %116 = math.absf %112 : vector<8x4xf32>
    %cst_36 = arith.constant 0.000000e+00 : f32
    %117 = vector.broadcast %cst_36 : f32 to vector<8x4xf32>
    %118 = arith.subf %117, %116 : vector<8x4xf32>
    %119 = math.exp %118 : vector<8x4xf32>
    %120 = math.log1p %119 : vector<8x4xf32>
    %121 = arith.addf %110, %120 : vector<8x4xf32>
    %122 = arith.select %113, %115, %121 : vector<8x4xi1>, vector<8x4xf32>
    %123 = vector.extract_strided_slice %107 {offsets = [0, 4], sizes = [8, 32], strides = [1, 1]} : vector<8x68xf32> to vector<8x32xf32>
    %124 = vector.extract_strided_slice %107 {offsets = [0, 36], sizes = [8, 32], strides = [1, 1]} : vector<8x68xf32> to vector<8x32xf32>
    %125 = arith.mulf %100, %101 : vector<8x32xf32>
    %cst_37 = arith.constant dense<0.000000e+00> : vector<8xf32>
    %126 = vector.multi_reduction <add>, %125, %cst_37 [1] : vector<8x32xf32> to vector<8xf32>
    %127 = vector.shape_cast %126 : vector<8xf32> to vector<8x1xf32>
    %128 = arith.mulf %100, %124 : vector<8x32xf32>
    %cst_38 = arith.constant dense<0.000000e+00> : vector<8xf32>
    %129 = vector.multi_reduction <add>, %128, %cst_38 [1] : vector<8x32xf32> to vector<8xf32>
    %130 = vector.shape_cast %129 : vector<8xf32> to vector<8x1xf32>
    %131 = arith.maximumf %127, %130 : vector<8x1xf32>
    %132 = arith.subf %127, %131 : vector<8x1xf32>
    %133 = math.exp %132 : vector<8x1xf32>
    %134 = arith.subf %130, %131 : vector<8x1xf32>
    %135 = math.exp %134 : vector<8x1xf32>
    %136 = arith.addf %133, %135 : vector<8x1xf32>
    %137 = arith.divf %133, %136 : vector<8x1xf32>
    %138 = vector.broadcast %137 : vector<8x1xf32> to vector<8x4xf32>
    %139 = arith.mulf %138, %99 : vector<8x4xf32>
    %140 = arith.divf %135, %136 : vector<8x1xf32>
    %141 = vector.broadcast %140 : vector<8x1xf32> to vector<8x4xf32>
    %142 = arith.mulf %141, %122 : vector<8x4xf32>
    %143 = arith.addf %139, %142 : vector<8x4xf32>
    %144 = arith.mulf %123, %101 : vector<8x32xf32>
    %cst_39 = arith.constant dense<0.000000e+00> : vector<8xf32>
    %145 = vector.multi_reduction <add>, %144, %cst_39 [1] : vector<8x32xf32> to vector<8xf32>
    %146 = vector.shape_cast %145 : vector<8xf32> to vector<8x1xf32>
    %147 = arith.mulf %123, %124 : vector<8x32xf32>
    %cst_40 = arith.constant dense<0.000000e+00> : vector<8xf32>
    %148 = vector.multi_reduction <add>, %147, %cst_40 [1] : vector<8x32xf32> to vector<8xf32>
    %149 = vector.shape_cast %148 : vector<8xf32> to vector<8x1xf32>
    %150 = arith.maximumf %146, %149 : vector<8x1xf32>
    %151 = arith.subf %146, %150 : vector<8x1xf32>
    %152 = math.exp %151 : vector<8x1xf32>
    %153 = arith.subf %149, %150 : vector<8x1xf32>
    %154 = math.exp %153 : vector<8x1xf32>
    %155 = arith.addf %152, %154 : vector<8x1xf32>
    %156 = arith.divf %152, %155 : vector<8x1xf32>
    %157 = vector.broadcast %156 : vector<8x1xf32> to vector<8x4xf32>
    %158 = arith.mulf %157, %99 : vector<8x4xf32>
    %159 = arith.divf %154, %155 : vector<8x1xf32>
    %160 = vector.broadcast %159 : vector<8x1xf32> to vector<8x4xf32>
    %161 = arith.mulf %160, %122 : vector<8x4xf32>
    %162 = arith.addf %158, %161 : vector<8x4xf32>
    %163 = arith.addf %143, %162 : vector<8x4xf32>
    %cst_41 = arith.constant 5.000000e-01 : f32
    %164 = vector.broadcast %cst_41 : f32 to vector<8x4xf32>
    %165 = arith.mulf %163, %164 : vector<8x4xf32>
    %166 = tpu.concatenate %7, %8 in 0 : vector<8x32xf32>, vector<8x32xf32> -> vector<16x32xf32>
    %cst_42 = arith.constant dense<0.000000e+00> : vector<16x8xf32>
    %167 = tpu.matmul %166, %28, %cst_42 {dimension_numbers = #tpu.dot_dimension_numbers<[1], [1], [0], [0], [0, 0, 1, 0], [], []>} : vector<16x32xf32>, vector<8x32xf32>, vector<16x8xf32> -> vector<16x8xf32>
    %168 = arith.mulf %167, %167 : vector<16x8xf32>
    %cst_43 = arith.constant dense<0.000000e+00> : vector<16xf32>
    %169 = vector.multi_reduction <add>, %168, %cst_43 [1] : vector<16x8xf32> to vector<16xf32>
    %170 = vector.shape_cast %169 : vector<16xf32> to vector<16x1xf32>
    %cst_44 = arith.constant dense<0.000000e+00> : vector<1xf32>
    %171 = vector.multi_reduction <add>, %170, %cst_44 [0] : vector<16x1xf32> to vector<1xf32>
    %172 = vector.shape_cast %171 : vector<1xf32> to vector<1x1xf32>
    %c0_45 = arith.constant 0 : index
    %c0_46 = arith.constant 0 : index
    %c0_47 = arith.constant 0 : index
    %173 = vector.load %arg2[%c0_45, %c0_46, %c0_47] : memref<6x8x4xf32, #tpu.memory_space<vmem>>, vector<1x8x4xf32>
    %174 = vector.shape_cast %173 : vector<1x8x4xf32> to vector<8x4xf32>
    %175 = vector.shape_cast %143 : vector<8x4xf32> to vector<1x8x4xf32>
    tpu.vector_store %arg2[%c0_45, %c0_46, %c0_47], %175 {strides = array<i32>} : memref<6x8x4xf32, #tpu.memory_space<vmem>>, vector<1x8x4xf32>,
    %c2 = arith.constant 2 : index
    %c0_48 = arith.constant 0 : index
    %c0_49 = arith.constant 0 : index
    %176 = vector.load %arg2[%c2, %c0_48, %c0_49] : memref<6x8x4xf32, #tpu.memory_space<vmem>>, vector<1x8x4xf32>
    %177 = vector.shape_cast %176 : vector<1x8x4xf32> to vector<8x4xf32>
    %178 = vector.shape_cast %99 : vector<8x4xf32> to vector<1x8x4xf32>
    tpu.vector_store %arg2[%c2, %c0_48, %c0_49], %178 {strides = array<i32>} : memref<6x8x4xf32, #tpu.memory_space<vmem>>, vector<1x8x4xf32>,
    %c1 = arith.constant 1 : index
    %c0_50 = arith.constant 0 : index
    %c0_51 = arith.constant 0 : index
    %179 = vector.load %arg2[%c1, %c0_50, %c0_51] : memref<6x8x4xf32, #tpu.memory_space<vmem>>, vector<1x8x4xf32>
    %180 = vector.shape_cast %179 : vector<1x8x4xf32> to vector<8x4xf32>
    %181 = vector.shape_cast %162 : vector<8x4xf32> to vector<1x8x4xf32>
    tpu.vector_store %arg2[%c1, %c0_50, %c0_51], %181 {strides = array<i32>} : memref<6x8x4xf32, #tpu.memory_space<vmem>>, vector<1x8x4xf32>,
    %c3 = arith.constant 3 : index
    %c0_52 = arith.constant 0 : index
    %c0_53 = arith.constant 0 : index
    %182 = vector.load %arg2[%c3, %c0_52, %c0_53] : memref<6x8x4xf32, #tpu.memory_space<vmem>>, vector<1x8x4xf32>
    %183 = vector.shape_cast %182 : vector<1x8x4xf32> to vector<8x4xf32>
    %184 = vector.shape_cast %122 : vector<8x4xf32> to vector<1x8x4xf32>
    tpu.vector_store %arg2[%c3, %c0_52, %c0_53], %184 {strides = array<i32>} : memref<6x8x4xf32, #tpu.memory_space<vmem>>, vector<1x8x4xf32>,
    %c4 = arith.constant 4 : index
    %c0_54 = arith.constant 0 : index
    %c0_55 = arith.constant 0 : index
    %185 = vector.load %arg2[%c4, %c0_54, %c0_55] : memref<6x8x4xf32, #tpu.memory_space<vmem>>, vector<1x8x4xf32>
    %186 = vector.shape_cast %185 : vector<1x8x4xf32> to vector<8x4xf32>
    %187 = vector.shape_cast %165 : vector<8x4xf32> to vector<1x8x4xf32>
    tpu.vector_store %arg2[%c4, %c0_54, %c0_55], %187 {strides = array<i32>} : memref<6x8x4xf32, #tpu.memory_space<vmem>>, vector<1x8x4xf32>,
    %cst_56 = arith.constant 0.000000e+00 : f32
    %188 = vector.broadcast %cst_56 : f32 to vector<1x1xf32>
    %189 = tpu.concatenate %55, %78, %172, %188 in 1 : vector<1x1xf32>, vector<1x1xf32>, vector<1x1xf32>, vector<1x1xf32> -> vector<1x4xf32>
    %190 = vector.shape_cast %189 : vector<1x4xf32> to vector<1x4xf32>
    %191 = vector.broadcast %190 : vector<1x4xf32> to vector<8x4xf32>
    %c5 = arith.constant 5 : index
    %c0_57 = arith.constant 0 : index
    %c0_58 = arith.constant 0 : index
    %192 = vector.load %arg2[%c5, %c0_57, %c0_58] : memref<6x8x4xf32, #tpu.memory_space<vmem>>, vector<1x8x4xf32>
    %193 = vector.shape_cast %192 : vector<1x8x4xf32> to vector<8x4xf32>
    %194 = vector.shape_cast %191 : vector<8x4xf32> to vector<1x8x4xf32>
    tpu.vector_store %arg2[%c5, %c0_57, %c0_58], %194 {strides = array<i32>} : memref<6x8x4xf32, #tpu.memory_space<vmem>>, vector<1x8x4xf32>,
    return
  }
}

</mosaic_0001>

<bundles_post_ra>
// kernel: gtmc_hoa_forward.1
= control target key start
LH: loop header
LB: loop body
LE: loop exit
PB: predicated region body
PF: predicated region fallthrough
CT: control target
= control target key end

     0   :  { %7 = vsyncpa [#allocation3], 0  ;;  %s1027_s9 = smov [#allocation2]   ;;  %s1196_s0 = inlined_call_operand.vmem [shape: f32[8,36], index: 0, kind: input, shape index: {}]   ;;  %s1197_s1 = inlined_call_operand.hbm [shape: f32[168,128], index: 1, kind: input, shape index: {}]   ;;  %s1198_s2 = inlined_call_operand.vmem [shape: f32[6,8,4], index: 2, kind: output, shape index: {}]  }
   0x1   :  { %s15_s10 = sshll.u32 %s1027_s9, 4  ;;  %s1003_s13 = scalar_lea.hbm %s1197_s1, 2688  ;;  %s16_s10 = int_to_ptr.vmem [resolvable:$true] %s15_s10 }
   0x2   :  { %p1004_p0 = scmp.ne.s32.totalorder %s1197_s1, %s1003_s13  ;;  %p1007_p1 = scmp.lt.u32.totalorder %s1003_s13, %s1197_s1 }
   0x4   :  { %p1009_p2 = pnand %p1007_p1, %p1004_p0 }
   0x6   :  { %1012 = shalt.err (!%p1009_p2)
}
   0x7   :  { %s1013_s18 = scalar_lea.vmem %s16_s10, 2688  ;;  %p1018_p4 = scmp.lt.s32.totalorder %s16_s10, %s16_s10 }
   0x8   :  { %p1014_p3 = scmp.ne.s32.totalorder %s16_s10, %s1013_s18  ;;  %p1019_p5 = scmp.lt.s32.totalorder %s1013_s18, %s1013_s18 }
   0xa   :  { %p1020_p6 = por %p1019_p5, %p1018_p4 }
   0xc   :  { %p1021_p7 = pnand %p1020_p6, %p1014_p3 }
   0xe   :  { %1024 = shalt.err (!%p1021_p7)
}
   0xf   :  { %s1028_s19 = smov 128   ;;  %s1029_s20 = smov 8  }
  0x10   :  { %21 = dma.hbm_to_vmem [thread:$0]  %s1197_s1, 2688, %s16_s10, [#allocation3], %s1028_s19, %s1028_s19, %s1029_s20  }
  0x11   :  { %1025 = dma.done.wait [#allocation3], 2688  }
  0x12   :  { %1026 = vsyncadd [#allocation3], 4294964608  ;;  %v1030_v0 = vmov 0.0|0.0   ;;  %vm1031_vm0 = vmmov 0   ;;  %v1032_v1 = vmov 0.0   ;;  %v26_v2 = vld [vmem:[#allocation2] sm:$0xff] }
  0x13   :  { %921 = vmatprep.subr.bf16.mxu0 %v1030_v0  ;;  %869 = vmatprep.mubr.msk.f32.mxu0 %vm1031_vm0, %v1032_v1  ;;  %v27_v3 = vld [vmem:[#allocation2 + $0x8] sm:$0xff]  ;;  %v28_v4 = vld [vmem:[#allocation2 + $0x10] sm:$0xff]  ;;  %v29_v6 = vld [vmem:[#allocation2 + $0x18] sm:$0xff]  ;;  %vm35_vm1 = vcmask 261120   ;;  %s1034_s24 = smov 96   ;;  %vm296_vm2 = vcmask 15360  }
  0x14   :  { %v922_v5 = vpack.c.bf16 %v27_v3, %v26_v2  ;;  %v925_v7 = vpack.c.bf16 %v29_v6, %v28_v4  ;;  %v1073_v8 = vld [vmem:[%s1196_s0] sm:$0xff]  ;;  %v113_v10 = vld [vmem:[#allocation2 + $0x28] sm:$0xff]  ;;  %v114_v11 = vld [vmem:[#allocation2 + $0x30] sm:$0xff]  ;;  %s1033_s0 = smov 64   ;;  %vm397_vm4 = vcmask 31744   ;;  %s1035_s27 = smov 124  }
  0x15   :  { %v112_v9 = vld [vmem:[#allocation2 + $0x20] sm:$0xff]  ;;  %v115_v13 = vld [vmem:[#allocation2 + $0x38] sm:$0xff]  ;;  %v205_v20 = vld [vmem:[#allocation2 + $0x48] sm:$0xff]  ;;  %s1036_s28 = smov 98   ;;  %s1037_s3 = smov 126   ;;  %vm773_vm12 = vcmask 64512  }
  0x16   :  { %923 = vmatpush3.bf16.msra.mxu0 %v922_v5  ;;  %v927_v12 = vpack.c.bf16 %v113_v10, %v112_v9  ;;  %v931_v14 = vpack.c.bf16 %v115_v13, %v114_v11  ;;  %v811_v15 = vld [vmem:[#allocation2 + $0xa0] ss:$0 sm:$0xff]  ;;  %v414_v25 = vld [vmem:[#allocation2 + $0x68] sm:$0xff]  ;;  %v206_v28 = vld [vmem:[#allocation2 + $0x50] sm:$0xff]  ;;  %vm332_vm13 = vcmask 15368   ;;  %s1038_s4 = smov 127  }
  0x17   :  { %924 = vmatprep.subr.bf16.mxu0 %v1030_v0  ;;  %v204_v19 = vld [vmem:[#allocation2 + $0x40] sm:$0xff]  ;;  %v207_v29 = vld [vmem:[#allocation2 + $0x58] sm:$0xff]  ;;  %v415_v30 = vld [vmem:[#allocation2 + $0x70] sm:$0xff]  ;;  %vm322_vm14 = vcmask 7168   ;;  %vm798_vm15 = vcmask 23552  }
  0x18   :  { %928 = vmatprep.subr.bf16.mxu1 %v927_v12  ;;  %v935_v21 = vpack.c.bf16 %v205_v20, %v204_v19  ;;  %v413_v24 = vld [vmem:[#allocation2 + $0x60] sm:$0xff]  ;;  %v939_v31 = vpack.c.bf16 %v207_v29, %v206_v28  ;;  %v416_v32 = vld [vmem:[#allocation2 + $0x78] sm:$0xff]  ;;  %v519_v43 = vld [vmem:[#allocation2 + $0x88] sm:$0xff] }
  0x19   :  { %930 = vmatpush3.bf16.msra.mxu1 %v927_v12  ;;  %v944_v26 = vpack.c.bf16 %v414_v25, %v413_v24  ;;  %v947_v33 = vpack.c.bf16 %v416_v32, %v415_v30  ;;  %v813_v34 = vld [vmem:[#allocation2 + $0xa1] ss:$0 sm:$0xff]  ;;  %v520_v44 = vld [vmem:[#allocation2 + $0x90] sm:$0xff]  ;;  %v521_v46 = vld [vmem:[#allocation2 + $0x98] sm:$0xff] }
  0x1a   :  { %926 = vmatpush3.bf16.msra.mxu0 %v925_v7  ;;  %932 = vmatprep.subr.bf16.mxu1 %v931_v14  ;;  %v518_v42 = vld [vmem:[#allocation2 + $0x80] sm:$0xff]  ;;  %v953_v47 = vpack.c.bf16 %v521_v46, %v520_v44 }
  0x1b   :  { %936 = vmatprep.subr.bf16.mxu0 %v935_v21  ;;  %v950_v45 = vpack.c.bf16 %v519_v43, %v518_v42  ;;  %v816_v50 = vld [vmem:[#allocation2 + $0xa2] ss:$0 sm:$0xff]  ;;  %v819_v56 = vld [vmem:[#allocation2 + $0xa3] ss:$0 sm:$0xff] }
  0x1d   :  { %870 = vmatmul.mubr.msk.f32.vlgmr.msra.gmra.mrb[0].mxu0 %vm35_vm1, %v1073_v8  ;;  %934 = vmatpush3.bf16.msra.mxu1 %v931_v14 }
  0x1e   :  { %943 = vmatprep.subr.bf16.mxu1 %v1030_v0  ;;  %938 = vmatpush3.bf16.msra.mxu0 %v935_v21 }
  0x1f   :  { %940 = vmatprep.subr.bf16.mxu0 %v939_v31 }
  0x22   :  { %942 = vmatpush3.bf16.msra.mxu0 %v939_v31 }
  0x23   :  { %949 = vmatprep.subr.bf16.mxu0 %v1030_v0 }
  0xf0   :  { %v105_v16 = vpop.f32.mrb[0].mxu0 }
  0xf1   :  { %v106_v17 = vadd.f32 %v811_v15, %v105_v16  ;;  %v871_v18 = vpop.f32.mrb[1].mxu0 }
  0xf3   :  { %110 = vrot.lane.b32.xlu0 %v106_v17, %s1033_s0 }
  0xf7   :  { %121 = vrot.lane.b32.xlu0 %v106_v17, %s1034_s24 }
 0x165   :  { %v111_v22 = vpop.permute.xlu0 %110 }
 0x166   :  { %123 = vrot.lane.b32.xlu1 %v111_v22, %s1034_s24 }
 0x169   :  { %v122_v23 = vpop.permute.xlu0 %121 }
 0x16a   :  { %880 = vmatprep.mubr.msk.f32.mxu1 %vm35_vm1, %v122_v23 }
 0x1d8   :  { %v124_v27 = vpop.permute.xlu1 %123 }
 0x1d9   :  { %881 = vmatmul.mubr.msk.f32.vlgmr.msra.gmra.mrb[0].mxu1 %vm35_vm1, %v124_v27 }
 0x1da   :  { %945 = vmatpush3.bf16.msra.mxu1 %v944_v26  ;;  %902 = vmatprep.mubr.msk.f32.mxu1 %vm1031_vm0, %v1032_v1 }
 0x1db   :  { %946 = vmatprep.subr.bf16.mxu1 %v1030_v0 }
 0x1de   :  { %948 = vmatpush3.bf16.msra.mxu1 %v947_v33 }
 0x2ac   :  { %v882_v35 = vpop.f32.mrb[0].mxu1 }
 0x2ad   :  { %v201_v36 = vadd.f32 %v882_v35, %v813_v34  ;;  %v195_v37 = vpop.f32.mrb[1].mxu1 }
 0x2ae   :  { %v196_v38 = vadd.f32 %v813_v34, %v195_v37 }
 0x2b0   :  { %v294_v39 = vadd.f32 %v201_v36, %v196_v38  ;;  %891 = vmatprep.mubr.msk.f32.mxu0 %vm35_vm1, %v196_v38 }
 0x2b1   :  { %892 = vmatmul.mubr.msk.f32.vlgmr.msra.gmra.mrb[2].mxu0 %vm35_vm1, %v201_v36 }
 0x2b2   :  { %v295_v40 = vmul.f32 0.5, %v294_v39  ;;  %913 = vmatprep.mubr.msk.f32.mxu0 %vm1031_vm0, %v1032_v1  ;;  %951 = vmatpush3.bf16.msra.mxu0 %v950_v45 }
 0x2b3   :  { %952 = vmatprep.subr.bf16.mxu0 %v1030_v0 }
 0x2b4   :  { %v412_v41 = vadd.f32 %v295_v40, %v106_v17  ;;  %514 = vrot.lane.b32.xlu1 %v295_v40, %s1033_s0  ;;  %916 = vmatprep.subr.msk.mxu1 %vm35_vm1, %v295_v40 }
 0x2b6   :  { %903 = vmatmul.mubr.msk.f32.vlgmr.msra.gmra.mrb[2].mxu1 %vm35_vm1, %v412_v41  ;;  %954 = vmatpush3.bf16.msra.mxu0 %v953_v47 }
 0x2b7   :  { %917 = vmatpush3.xpose.msk.msra.mxu1 %vm35_vm1, %v295_v40  ;;  %918 = vmatprep.mubr.msk.f32.mxu1 %vm35_vm1, %v106_v17 }
 0x2ba   :  { %919 = vmatmul.mubr.msk.f32.vlgmr.msra.gmra.mrb[4].mxu1 %vm35_vm1, %v111_v22 }
 0x326   :  { %v515_v48 = vpop.permute.xlu1 %514 }
 0x327   :  { %v517_v49 = vadd.f32 %v515_v48, %v106_v17  ;;  %v821_v17 = vld [vmem:[#allocation2 + $0xa4] ss:$0 sm:$0xff] }
 0x329   :  { %528 = vrot.lane.b32.xlu0 %v517_v49, %s1033_s0 }
 0x384   :  { %v893_v51 = vpop.f32.mrb[2].mxu0 }
 0x385   :  { %v1099_v52 = vadd.f32 %v893_v51, %v816_v50  ;;  %v285_v53 = vpop.f32.mrb[3].mxu0 }
 0x386   :  { %v1101_v54 = vadd.f32 %v816_v50, %v285_v53 }
 0x387   :  { %v300_v55 = vsel %vm296_vm2, %v1099_v52, -inf  ;;  %v353_v38 = vand.u32 2147483647, %v1099_v52  ;;  %vm349_vm11 = vcmp.ne.f32.partialorder %v1099_v52, %v1099_v52 }
 0x388   :  { %301 = vmax.xlane.f32.xlu1 %v300_v55  ;;  %v297_v36 = vsel %vm296_vm2, %v1101_v54, -inf  ;;  %v352_v37 = vand.u32 2147483647, %v1101_v54  ;;  %vm348_vm10 = vcmp.ne.f32.partialorder %v1101_v54, %v1101_v54 }
 0x389   :  { %v491_v57 = vpop.f32.mrb[2].mxu1  ;;  %v355_v40 = vsub.f32 0.0, %v353_v38 }
 0x38a   :  { %v1105_v58 = vadd.f32 %v819_v56, %v491_v57  ;;  %v904_v59 = vpop.f32.mrb[3].mxu1  ;;  %v354_v39 = vsub.f32 0.0, %v352_v37 }
 0x38b   :  { %v358_v42 = vmul.f32 1.442695, %v355_v40 }
 0x38c   :  { %v498_v60 = vand.u32 2147483647, %v1105_v58  ;;  %621 = vrot.lane.b32.xlu0 %v1105_v58, %s1034_s24  ;;  %v495_v11 = vmax.f32 %v1105_v58, 0.0  ;;  %vm496_vm5 = vcmp.ne.f32.partialorder %v1105_v58, %v1105_v58  ;;  %v356_v41 = vmul.f32 1.442695, %v354_v39 }
 0x38d   :  { %v1110_v61 = vpop.f32.mrb[4].mxu1 }
 0x38e   :  { %v499_v62 = vsub.f32 0.0, %v498_v60  ;;  %v1112_v63 = vpop.f32.mrb[5].mxu1  ;;  %v772_v37 = vmul.f32 %v1110_v61, %v1110_v61 }
 0x390   :  { %v500_v0 = vmul.f32 1.442695, %v499_v62  ;;  %v777_v40 = vsel %vm773_vm12, %v772_v37, 0.0 }
 0x392   :  { %967 = vpow2.f32 %v500_v0 }
 0x39b   :  { %v529_v1 = vpop.permute.xlu0 %528 }
 0x39c   :  { %v968_v2 = vpop.eup %967  ;;  %914 = vmatmul.mubr.msk.f32.vlgmr.msra.gmra.mrb[4].mxu0 %vm35_vm1, %v529_v1  ;;  %v346_v1 = vmax.f32 %v1101_v54, 0.0 }
 0x39d   :  { %v502_v3 = vadd.f32 1.0, %v968_v2  ;;  %v505_v4 = vmul.f32 -0.5, %v968_v2  ;;  %v508_v6 = vand.u32 2147483647, %v968_v2 }
 0x39f   :  { %969 = vlog2.f32 %v502_v3  ;;  %v506_v5 = vadd.f32 1.0, %v505_v4  ;;  %vm509_vm3 = vcmp.lt.f32.partialorder %v508_v6, 0.0004427343 }
 0x3a1   :  { %v507_v10 = vmul.f32 %v968_v2, %v506_v5 }
 0x3a9   :  { %v970_v7 = vpop.eup %969 }
 0x3aa   :  { %v504_v9 = vmul.f32 0.6931472, %v970_v7  ;;  %v347_v7 = vmax.f32 %v1099_v52, 0.0 }
 0x3ac   :  { %v510_v12 = vsel %vm509_vm3, %v507_v10, %v504_v9 }
 0x3ad   :  { %v511_v13 = vadd.f32 %v510_v12, %v495_v11 }
 0x3af   :  { %v1119_v14 = vsel %vm496_vm5, %v1105_v58, %v511_v13 }
 0x3b0   :  { %826 = vst.msk [vmem:[%s1198_s2 + $0x10] sm:$0xff] %vm397_vm4, %v1119_v14 }
 0x3fe   :  { %v622_v15 = vpop.permute.xlu0 %621 }
 0x3ff   :  { %v624_v16 = vmul.f32 %v622_v15, %v1105_v58 }
 0x401   :  { %626 = vrot.lane.b32.xlu1 %v624_v16, %s1035_s27 }
 0x46f   :  { %v598_v18 = vpop.f32.mrb[4].mxu0 }
 0x470   :  { %v599_v19 = vadd.f32 %v821_v17, %v598_v18  ;;  %v915_v20 = vpop.f32.mrb[5].mxu0  ;;  %v302_v17 = vpop.xlane.xlu1 %301 }
 0x471   :  { %v304_v18 = vsub.f32 %v1099_v52, %v302_v17 }
 0x472   :  { %v605_v21 = vand.u32 2147483647, %v599_v19  ;;  %633 = vrot.lane.b32.xlu0 %v599_v19, %s1034_s24  ;;  %v658_v22 = vmul.f32 %v622_v15, %v599_v19  ;;  %v602_v33 = vmax.f32 %v599_v19, 0.0  ;;  %vm603_vm7 = vcmp.ne.f32.partialorder %v599_v19, %v599_v19 }
 0x474   :  { %v606_v23 = vsub.f32 0.0, %v605_v21  ;;  %660 = vrot.lane.b32.xlu1 %v658_v22, %s1035_s27  ;;  %v627_v21 = vpop.permute.xlu1 %626 }
 0x476   :  { %v607_v24 = vmul.f32 1.442695, %v606_v23  ;;  %382 = vrot.lane.b32.xlu0 %v1073_v8, %s1036_s28 }
 0x478   :  { %971 = vpow2.f32 %v607_v24 }
 0x482   :  { %v972_v25 = vpop.eup %971 }
 0x483   :  { %v609_v26 = vadd.f32 1.0, %v972_v25  ;;  %v612_v27 = vmul.f32 -0.5, %v972_v25  ;;  %v615_v29 = vand.u32 2147483647, %v972_v25 }
 0x485   :  { %973 = vlog2.f32 %v609_v26  ;;  %v613_v28 = vadd.f32 1.0, %v612_v27  ;;  %vm616_vm6 = vcmp.lt.f32.partialorder %v615_v29, 0.0004427343 }
 0x486   :  { %975 = vpow2.f32 %v356_v41 }
 0x487   :  { %v614_v32 = vmul.f32 %v972_v25, %v613_v28  ;;  %977 = vpow2.f32 %v358_v42  ;;  %v629_v25 = vsel %vm35_vm1, %v627_v21, 0.0 }
 0x48f   :  { %v974_v30 = vpop.eup %973 }
 0x490   :  { %v611_v31 = vmul.f32 0.6931472, %v974_v30  ;;  %v976_v43 = vpop.eup %975 }
 0x491   :  { %v360_v44 = vadd.f32 1.0, %v976_v43  ;;  %v978_v45 = vpop.eup %977  ;;  %v363_v47 = vmul.f32 -0.5, %v976_v43  ;;  %v366_v51 = vand.u32 2147483647, %v976_v43 }
 0x492   :  { %v617_v34 = vsel %vm616_vm6, %v614_v32, %v611_v31  ;;  %v369_v46 = vadd.f32 1.0, %v978_v45  ;;  %v372_v49 = vmul.f32 -0.5, %v978_v45  ;;  %v375_v59 = vand.u32 2147483647, %v978_v45 }
 0x493   :  { %v618_v35 = vadd.f32 %v617_v34, %v602_v33  ;;  %979 = vlog2.f32 %v360_v44  ;;  %v364_v50 = vadd.f32 1.0, %v363_v47  ;;  %vm367_vm8 = vcmp.lt.f32.partialorder %v366_v51, 0.0004427343 }
 0x494   :  { %981 = vlog2.f32 %v369_v46  ;;  %v373_v56 = vadd.f32 1.0, %v372_v49  ;;  %vm376_vm9 = vcmp.lt.f32.partialorder %v375_v59, 0.0004427343 }
 0x495   :  { %298 = vmax.xlane.f32.xlu0 %v297_v36  ;;  %v1133_v8 = vsel %vm603_vm7, %v599_v19, %v618_v35  ;;  %v365_v57 = vmul.f32 %v976_v43, %v364_v50 }
 0x496   :  { %828 = vst.msk [vmem:[%s1198_s2 + $0x18] sm:$0xff] %vm397_vm4, %v1133_v8  ;;  %v374_v4 = vmul.f32 %v978_v45, %v373_v56 }
 0x49d   :  { %v980_v48 = vpop.eup %979 }
 0x49e   :  { %v362_v53 = vmul.f32 0.6931472, %v980_v48  ;;  %v982_v55 = vpop.eup %981 }
 0x49f   :  { %v371_v60 = vmul.f32 0.6931472, %v982_v55 }
 0x4a0   :  { %v368_v62 = vsel %vm367_vm8, %v365_v57, %v362_v53 }
 0x4a1   :  { %v378_v5 = vadd.f32 %v368_v62, %v346_v1  ;;  %v377_v6 = vsel %vm376_vm9, %v374_v4, %v371_v60 }
 0x4a2   :  { %v379_v11 = vadd.f32 %v377_v6, %v347_v7 }
 0x4a4   :  { %v381_v15 = vsel %vm349_vm11, %v1099_v52, %v379_v11 }
 0x4e4   :  { %v634_v0 = vpop.permute.xlu0 %633 }
 0x4e5   :  { %v636_v2 = vmul.f32 %v634_v0, %v1105_v58  ;;  %v666_v3 = vmul.f32 %v634_v0, %v599_v19  ;;  %v380_v58 = vsel %vm348_vm10, %v1101_v54, %v378_v5  ;;  %v307_v19 = vmul.f32 1.442695, %v304_v18 }
 0x4e6   :  { %v661_v23 = vpop.permute.xlu1 %660 }
 0x4e7   :  { %668 = vrot.lane.b32.xlu1 %v666_v3, %s1035_s27  ;;  %638 = vrot.lane.b32.xlu0 %v636_v2, %s1035_s27  ;;  %983 = vpow2.f32 %v307_v19  ;;  %v663_v24 = vsel %vm35_vm1, %v661_v23, 0.0 }
 0x4e8   :  { %v383_v9 = vpop.permute.xlu0 %382 }
 0x4e9   :  { %v385_v10 = vmul.f32 %v383_v9, %v1101_v54  ;;  %v386_v12 = vmul.f32 %v383_v9, %v1099_v52 }
 0x4eb   :  { %v387_v13 = vsub.f32 %v380_v58, %v385_v10  ;;  %v388_v16 = vsub.f32 %v381_v15, %v386_v12 }
 0x4ed   :  { %391 = vrot.lane.b32.xlu0 %v387_v13, %s1037_s3 }
 0x4f1   :  { %393 = vrot.lane.b32.xlu0 %v388_v16, %s1037_s3  ;;  %v984_v20 = vpop.eup %983 }
 0x4f2   :  { %v312_v22 = vsel %vm296_vm2, %v984_v20, 0.0 }
 0x50b   :  { %313 = vadd.xlane.f32.xlu1 %v312_v22 }
 0x50f   :  { %664 = vadd.xlane.f32.xlu1 %v663_v24 }
 0x510   :  { %630 = vadd.xlane.f32.xlu0 %v629_v25 }
 0x522   :  { %v299_v26 = vpop.xlane.xlu0 %298 }
 0x523   :  { %v1160_v27 = vsub.f32 %v1101_v54, %v299_v26  ;;  %v771_v54 = vmul.f32 %v1112_v63, %v1112_v63 }
 0x525   :  { %v305_v52 = vmul.f32 1.442695, %v1160_v27  ;;  %v774_v39 = vsel %vm773_vm12, %v771_v54, 0.0 }
 0x527   :  { %985 = vpow2.f32 %v305_v52 }
 0x531   :  { %v986_v28 = vpop.eup %985 }
 0x532   :  { %v309_v29 = vsel %vm296_vm2, %v986_v28, 0.0 }
 0x533   :  { %310 = vadd.xlane.f32.xlu0 %v309_v29 }
 0x559   :  { %v639_v30 = vpop.permute.xlu0 %638  ;;  %v669_v32 = vpop.permute.xlu1 %668 }
 0x55a   :  { %v641_v31 = vsel %vm35_vm1, %v639_v30, 0.0  ;;  %v671_v33 = vsel %vm35_vm1, %v669_v32, 0.0 }
 0x55b   :  { %642 = vadd.xlane.f32.xlu1 %v641_v31 }
 0x55f   :  { %672 = vadd.xlane.f32.xlu1 %v671_v33  ;;  %v392_v34 = vpop.permute.xlu0 %391 }
 0x560   :  { %v398_v35 = vsel %vm397_vm4, %v392_v34, 0.0 }
 0x563   :  { %399 = vadd.xlane.f32.xlu1 %v398_v35  ;;  %v394_v36 = vpop.permute.xlu0 %393 }
 0x564   :  { %v401_v38 = vsel %vm397_vm4, %v394_v36, 0.0 }
 0x565   :  { %402 = vadd.xlane.f32.xlu0 %v401_v38 }
 0x567   :  { %775 = vadd.xlane.f32.xlu1 %v774_v39 }
 0x569   :  { %778 = vadd.xlane.f32.xlu0 %v777_v40 }
 0x598   :  { %v314_v41 = vpop.xlane.xlu1 %313 }
 0x599   :  { %987 = vlog2.f32 %v314_v41 }
 0x59c   :  { %v665_v51 = vpop.xlane.xlu1 %664 }
 0x59d   :  { %v631_v53 = vpop.xlane.xlu0 %630 }
 0x5a3   :  { %v988_v42 = vpop.eup %987 }
 0x5a4   :  { %v318_v43 = vmul.f32 0.6931472, %v988_v42 }
 0x5a6   :  { %v320_v63 = vsub.f32 %v304_v18, %v318_v43 }
 0x5a8   :  { %v331_v44 = vsub.f32 0.0, %v320_v63 }
 0x5aa   :  { %v333_v45 = vsel %vm332_vm13, %v331_v44, 0.0 }
 0x5ab   :  { %v334_v46 = vrot.slane %v333_v45, 4 }
 0x5ad   :  { %v335_v47 = vadd.f32 %v334_v46, %v333_v45 }
 0x5af   :  { %v336_v48 = vrot.slane %v335_v47, 2 }
 0x5b1   :  { %v337_v49 = vadd.f32 %v336_v48, %v335_v47  ;;  %v800_v48 = vlaneseq }
 0x5b3   :  { %v338_v61 = vrot.slane %v337_v49, 1 }
 0x5b5   :  { %v339_v50 = vadd.f32 %v338_v61, %v337_v49 }
 0x5b7   :  { %341 = vrot.lane.b32.xlu1 %v339_v50, %s1038_s4 }
 0x5c0   :  { %v311_v6 = vpop.xlane.xlu0 %310 }
 0x5e8   :  { %v643_v55 = vpop.xlane.xlu1 %642 }
 0x5e9   :  { %v644_v56 = vmax.f32 %v631_v53, %v643_v55 }
 0x5eb   :  { %v645_v57 = vsub.f32 %v631_v53, %v644_v56  ;;  %v648_v59 = vsub.f32 %v643_v55, %v644_v56 }
 0x5ec   :  { %v673_v60 = vpop.xlane.xlu1 %672 }
 0x5ed   :  { %v646_v62 = vmul.f32 1.442695, %v645_v57  ;;  %v649_v0 = vmul.f32 1.442695, %v648_v59  ;;  %v674_v1 = vmax.f32 %v665_v51, %v673_v60 }
 0x5ef   :  { %989 = vpow2.f32 %v646_v62  ;;  %v675_v2 = vsub.f32 %v665_v51, %v674_v1  ;;  %v678_v3 = vsub.f32 %v673_v60, %v674_v1  ;;  %v801_v51 = vshrl.u32 %v800_v48, 7 }
 0x5f0   :  { %991 = vpow2.f32 %v649_v0 }
 0x5f1   :  { %v676_v4 = vmul.f32 1.442695, %v675_v2  ;;  %v679_v5 = vmul.f32 1.442695, %v678_v3  ;;  %v802_v60 = vsub.s32 0, %v801_v51 }
 0x5f2   :  { %v403_v26 = vpop.xlane.xlu0 %402 }
 0x5f3   :  { %993 = vpow2.f32 %v676_v4 }
 0x5f4   :  { %995 = vpow2.f32 %v679_v5 }
 0x5f5   :  { %997 = vlog2.f32 %v311_v6 }
 0x5f6   :  { %v779_v34 = vpop.xlane.xlu0 %778 }
 0x5f9   :  { %v990_v7 = vpop.eup %989 }
 0x5fa   :  { %v992_v9 = vpop.eup %991 }
 0x5fb   :  { %v651_v10 = vadd.f32 %v992_v9, %v990_v7 }
 0x5fd   :  { %v994_v11 = vpop.eup %993  ;;  %999 = vrcp.f32 %v651_v10 }
 0x5fe   :  { %v996_v58 = vpop.eup %995 }
 0x5ff   :  { %v681_v12 = vadd.f32 %v996_v58, %v994_v11  ;;  %v998_v13 = vpop.eup %997 }
 0x600   :  { %v316_v15 = vmul.f32 0.6931472, %v998_v13 }
 0x601   :  { %1001 = vrcp.f32 %v681_v12 }
 0x602   :  { %v319_v19 = vsub.f32 %v1160_v27, %v316_v15  ;;  %v400_v27 = vpop.xlane.xlu1 %399 }
 0x603   :  { %v404_v31 = vadd.f32 %v403_v26, %v400_v27 }
 0x604   :  { %v321_v52 = vsub.f32 0.0, %v319_v19 }
 0x605   :  { %v405_v35 = vrot.slane %v404_v31, 4 }
 0x606   :  { %v323_v32 = vsel %vm322_vm14, %v321_v52, 0.0  ;;  %v776_v36 = vpop.xlane.xlu1 %775 }
 0x607   :  { %v1000_v16 = vpop.eup %999  ;;  %v324_v37 = vrot.slane %v323_v32, 4 }
 0x608   :  { %v653_v17 = vmul.f32 %v1000_v16, %v990_v7  ;;  %v655_v18 = vmul.f32 %v1000_v16, %v992_v9 }
 0x609   :  { %v325_v38 = vadd.f32 %v324_v37, %v323_v32 }
 0x60a   :  { %v654_v20 = vmul.f32 %v653_v17, %v1119_v14  ;;  %v656_v21 = vmul.f32 %v655_v18, %v1133_v8 }
 0x60b   :  { %v1002_v22 = vpop.eup %1001  ;;  %v326_v41 = vrot.slane %v325_v38, 2 }
 0x60c   :  { %v657_v23 = vadd.f32 %v656_v21, %v654_v20  ;;  %v683_v24 = vmul.f32 %v1002_v22, %v994_v11  ;;  %v685_v25 = vmul.f32 %v1002_v22, %v996_v58 }
 0x60d   :  { %v327_v63 = vadd.f32 %v326_v41, %v325_v38 }
 0x60e   :  { %787 = vst.msk [vmem:[%s1198_s2] sm:$0xff] %vm397_vm4, %v657_v23  ;;  %v684_v28 = vmul.f32 %v683_v24, %v1119_v14  ;;  %v686_v29 = vmul.f32 %v685_v25, %v1133_v8  ;;  %v780_v14 = vadd.f32 %v779_v34, %v776_v36  ;;  %v406_v8 = vadd.f32 %v405_v35, %v404_v31 }
 0x60f   :  { %v328_v46 = vrot.slane %v327_v63, 1 }
 0x610   :  { %v687_v30 = vadd.f32 %v686_v29, %v684_v28  ;;  %v781_v39 = vrot.slane %v780_v14, 4  ;;  %v407_v40 = vrot.slane %v406_v8, 2 }
 0x611   :  { %v329_v61 = vadd.f32 %v328_v46, %v327_v63 }
 0x612   :  { %v688_v33 = vadd.f32 %v687_v30, %v657_v23  ;;  %827 = vst.msk [vmem:[%s1198_s2 + $0x8] sm:$0xff] %vm397_vm4, %v687_v30  ;;  %v782_v42 = vadd.f32 %v781_v39, %v780_v14  ;;  %v408_v43 = vadd.f32 %v407_v40, %v406_v8 }
 0x614   :  { %v689_v54 = vmul.f32 0.5, %v688_v33  ;;  %v783_v44 = vrot.slane %v782_v42, 2  ;;  %v409_v45 = vrot.slane %v408_v43, 1 }
 0x616   :  { %829 = vst.msk [vmem:[%s1198_s2 + $0x20] sm:$0xff] %vm397_vm4, %v689_v54  ;;  %v784_v47 = vadd.f32 %v783_v44, %v782_v42  ;;  %v410_v49 = vadd.f32 %v409_v45, %v408_v43 }
 0x618   :  { %v785_v50 = vrot.slane %v784_v47, 1  ;;  %v411_v56 = vmul.f32 0.015625, %v410_v49 }
 0x61a   :  { %v786_v59 = vadd.f32 %v785_v50, %v784_v47 }
 0x629   :  { %v342_v53 = vpop.permute.xlu1 %341 }
 0x62a   :  { %v344_v55 = vadd.f32 %v342_v53, %v329_v61 }
 0x62c   :  { %v345_v57 = vmul.f32 0.0625, %v344_v55 }
 0x62e   :  { %v796_v62 = vsel %vm322_vm14, %v345_v57, %v411_v56 }
 0x62f   :  { %v797_v0 = vsel %vm296_vm2, %v796_v62, %v786_v59 }
 0x630   :  { %v799_v1 = vsel %vm798_vm15, %v797_v0, 0.0 }
 0x631   :  { %v803_v2 = vrot.slane %v799_v1, %v802_v60 }
 0x633   :  { %830 = vst.msk [vmem:[%s1198_s2 + $0x28] sm:$0xff] %vm397_vm4, %v803_v2 }
 0x634   :  { %810 = vsyncpa [#allocation3], 1 }

</bundles_post_ra>
